<compile_context>
chip_gen: v7x
topology: tpu7x:2x2x1
jax: 0.10.0
libtpu: 0.0.40
codegen_flags: <defaults>
</compile_context>

<pallas_src>
import functools

import jax
import jax.numpy as jnp
from jax.experimental import pallas as pl
from jax.experimental.pallas import tpu as pltpu

EPS = 1e-5  # torch.nn.LayerNorm default


def _round_up(x, m):
    return (x + m - 1) // m * m


def _vmem_capacity_bytes():
    """Physical VMEM per TensorCore; conservative (v7x) fallback."""
    try:
        info = pltpu.get_tpu_info()
        cap = int(getattr(info, "vmem_capacity_bytes", 0) or 0)
        if cap > 0:
            return cap
    except Exception:
        pass
    return 64 << 20


_VMEM_CAP = _vmem_capacity_bytes()


def _layernorm_rows_f32(x_ref, gamma_ref, beta_ref, d_valid, d_padded):
    """LayerNorm over the last dim, f32 math, masked to the true feature dim."""
    x = x_ref[...].astype(jnp.float32)
    inv_d = 1.0 / float(d_valid)
    if d_valid != d_padded:
        lane = jax.lax.broadcasted_iota(jnp.int32, x.shape, 1)
        mask = (lane < d_valid).astype(jnp.float32)
        x = x * mask
    mean = jnp.sum(x, axis=-1, keepdims=True) * inv_d
    xc = x - mean
    if d_valid != d_padded:
        xc = xc * mask
    var = jnp.sum(xc * xc, axis=-1, keepdims=True) * inv_d
    xn = xc * jax.lax.rsqrt(var + EPS)
    return xn * gamma_ref[...].astype(jnp.float32) + beta_ref[...].astype(jnp.float32)


def prenorm_single_tile_kernel(x_ref, gamma_ref, beta_ref, w_ref, b_ref, o_ref,
                               *, d_valid, d_padded, mm_dtype):
    # Whole weight resident (single column tile): LN output stays in registers
    # and feeds the MXU directly -- no VMEM scratch round trip.
    y = _layernorm_rows_f32(x_ref, gamma_ref, beta_ref, d_valid, d_padded)
    out = jnp.dot(y.astype(mm_dtype), w_ref[...],
                  preferred_element_type=jnp.float32)
    out = out + b_ref[...].astype(jnp.float32)
    o_ref[...] = out.astype(o_ref.dtype)


def prenorm_coltiled_kernel(x_ref, gamma_ref, beta_ref, w_ref, b_ref, o_ref,
                            y_ref, *, d_valid, d_padded):
    # Column-tiled weight: compute LN once per row tile (j == 0) into VMEM
    # scratch, reuse it for every column tile j.  Dim 1 must be sequential
    # ("arbitrary"), never "parallel".
    j = pl.program_id(1)

    @pl.when(j == 0)
    def _():
        y = _layernorm_rows_f32(x_ref, gamma_ref, beta_ref, d_valid, d_padded)
        y_ref[...] = y.astype(y_ref.dtype)

    out = jnp.dot(y_ref[...], w_ref[...], preferred_element_type=jnp.float32)
    out = out + b_ref[...].astype(jnp.float32)
    o_ref[...] = out.astype(o_ref.dtype)


@functools.partial(jax.jit, static_argnames=("block_rows", "cast_matmul_to_bf16"))
def prenorm(x, gamma, beta, w, b, *, block_rows=1024, cast_matmul_to_bf16=False):
    """x: (B, S, D). Returns fn(LayerNorm(x)) with fn = Linear: y @ w + b."""
    B, S, D = x.shape
    M = B * S
    x2 = x.reshape(M, D)
    g2 = gamma.reshape(1, D)
    be2 = beta.reshape(1, D)
    b2 = b.reshape(1, D)

    in_itemsize = jnp.dtype(x.dtype).itemsize
    out_itemsize = in_itemsize

    # Matmul dtype: native promotion; optional bf16 downcast for f32 callers.
    mm_dtype = jnp.dtype(jnp.promote_types(x.dtype, w.dtype))
    if cast_matmul_to_bf16 and mm_dtype == jnp.dtype(jnp.float32):
        mm_dtype = jnp.dtype(jnp.bfloat16)
    if w.dtype != mm_dtype:
        w = w.astype(mm_dtype)          # one-time cast; also halves W traffic
    wbytes = jnp.dtype(mm_dtype).itemsize

    # dtype-aware sublane multiple: 8 for f32, 16 for bf16, 32 for 8-bit.
    sub = {4: 8, 2: 16, 1: 32}.get(in_itemsize, 8)
    lane = 128
    Dp = _round_up(D, lane)             # lane-dense feature dim

    # ---- generation-aware VMEM budget ----
    vmem_cap = _VMEM_CAP
    limit_cap = max(32 << 20, vmem_cap - (16 << 20))   # leave Mosaic headroom
    tile_budget = int(limit_cap * 0.8)
    big_vmem = vmem_cap >= (96 << 20)                  # v5e / v6e (128 MiB)
    wcap = (24 << 20) if big_vmem else (8 << 20)       # per weight buffer

    # ---- column tile: prefer whole-W residency; else a divisor of Dp ----
    if Dp * Dp * wbytes <= wcap:
        tn = Dp
    else:
        cands = [d for d in range(lane, Dp + 1, lane) if Dp % d == 0]
        fits = [d for d in cands if Dp * d * wbytes <= wcap]
        pool = fits if fits else cands[:1]
        m256 = [d for d in pool if d % 256 == 0]       # MXU-friendly on v6e/v7x
        tn = max(m256) if m256 else max(pool)
    Np = Dp                                            # tn divides Dp -> no inflation
    n_col = Np // tn
    single_col = n_col == 1

    # ---- row tile: start big, clamp to budget, keep >=2 tiles for v7x cores ----
    tm = min(_round_up(block_rows, sub), _round_up(M, sub))

    def vmem_need(tm_):
        need = (2 * tm_ * Dp * in_itemsize        # x tiles (double-buffered)
                + 2 * tm_ * tn * out_itemsize     # out tiles
                + 2 * Dp * tn * wbytes            # weight tiles
                + 4 * Dp * 4 + 2 * tn * 4)        # gamma/beta/bias (generous)
        if not single_col:
            need += tm_ * Dp * wbytes             # y scratch (mm_dtype)
        return need

    while tm > sub and vmem_need(tm) > tile_budget:
        tm = _round_up(max(sub, tm // 2), sub)
    if pl.cdiv(M, tm) < 2 and M >= 2 * sub:       # both v7x TCs get work
        tm = _round_up(pl.cdiv(M, 2), sub)
    n_row = pl.cdiv(M, tm)

    # ---- pad ONLY the feature dim; ragged M handled by the grid itself ----
    if Dp != D:
        x2 = jnp.pad(x2, ((0, 0), (0, Dp - D)))
        g2 = jnp.pad(g2, ((0, 0), (0, Dp - D)))
        be2 = jnp.pad(be2, ((0, 0), (0, Dp - D)))
        b2 = jnp.pad(b2, ((0, 0), (0, Dp - D)))
        w = jnp.pad(w, ((0, Dp - D), (0, Dp - D)))

    vmem_limit = int(min(limit_cap, max(32 << 20, vmem_need(tm) + (4 << 20))))

    # W is re-streamed once per row tile only when column tiling is active.
    w_stream = Dp * Np * wbytes * (1 if single_col else n_row)
    cost = pl.CostEstimate(
        flops=2 * M * Dp * Np,
        transcendentals=M,                          # one rsqrt per row
        bytes_accessed=int(M * Dp * in_itemsize + w_stream + M * Np * out_itemsize),
    )

    if single_col:
        kernel = functools.partial(prenorm_single_tile_kernel,
                                   d_valid=D, d_padded=Dp, mm_dtype=mm_dtype)
        grid_spec = pltpu.PrefetchScalarGridSpec(
            num_scalar_prefetch=0,
            grid=(n_row,),
            in_specs=[
                pl.BlockSpec((tm, Dp), lambda i: (i, 0)),   # x rows
                pl.BlockSpec((1, Dp), lambda i: (0, 0)),    # gamma
                pl.BlockSpec((1, Dp), lambda i: (0, 0)),    # beta
                pl.BlockSpec((Dp, Np), lambda i: (0, 0)),   # whole weight, resident
                pl.BlockSpec((1, Np), lambda i: (0, 0)),    # bias
            ],
            out_specs=pl.BlockSpec((tm, Np), lambda i: (i, 0)),
        )
        dim_sem = ("parallel",)
    else:
        kernel = functools.partial(prenorm_coltiled_kernel, d_valid=D, d_padded=Dp)
        grid_spec = pltpu.PrefetchScalarGridSpec(
            num_scalar_prefetch=0,
            grid=(n_row, n_col),
            in_specs=[
                pl.BlockSpec((tm, Dp), lambda i, j: (i, 0)),   # x rows
                pl.BlockSpec((1, Dp), lambda i, j: (0, 0)),    # gamma
                pl.BlockSpec((1, Dp), lambda i, j: (0, 0)),    # beta
                pl.BlockSpec((Dp, tn), lambda i, j: (0, j)),   # weight cols
                pl.BlockSpec((1, tn), lambda i, j: (0, j)),    # bias cols
            ],
            out_specs=pl.BlockSpec((tm, tn), lambda i, j: (i, j)),
            scratch_shapes=[pltpu.VMEM((tm, Dp), mm_dtype)],
        )
        # dim 1 MUST stay "arbitrary": y scratch written at j==0, read at j>0.
        dim_sem = ("parallel", "arbitrary")

    out_p = pl.pallas_call(
        kernel,
        out_shape=jax.ShapeDtypeStruct((M, Np), x.dtype),
        grid_spec=grid_spec,
        compiler_params=pltpu.CompilerParams(
            dimension_semantics=dim_sem,
            vmem_limit_bytes=vmem_limit,
        ),
        cost_estimate=cost,
    )(x2, g2, be2, w, b2)

    out = out_p if Np == D else out_p[:, :D]
    return out.reshape(B, S, D)


def reference(x, gamma, beta, w, b):
    xf = x.astype(jnp.float32)
    mean = jnp.mean(xf, axis=-1, keepdims=True)
    var = jnp.mean((xf - mean) ** 2, axis=-1, keepdims=True)
    xn = (xf - mean) * jax.lax.rsqrt(var + EPS)
    y = xn * gamma.astype(jnp.float32) + beta.astype(jnp.float32)
    return (y @ w.astype(jnp.float32) + b.astype(jnp.float32)).astype(x.dtype)


if __name__ == "__main__":
    B, S, D = 2, 8, 32
    key = jax.random.PRNGKey(0)
    kx, kw, kb = jax.random.split(key, 3)

    x = jax.random.normal(kx, (B, S, D), dtype=jnp.float32)

    # Deterministic parameters (LayerNorm default: gamma=1, beta=0).
    gamma = jnp.ones((D,), dtype=jnp.float32)
    beta = jnp.zeros((D,), dtype=jnp.float32)
    # TODO(synk): `fn` is injected at runtime in the PyTorch module; we
    # instantiate it deterministically as Linear(D, D).
    w = jax.random.normal(kw, (D, D), dtype=jnp.float32) / jnp.sqrt(D)
    b = jax.random.normal(kb, (D,), dtype=jnp.float32) * 0.01

    out = jax.block_until_ready(prenorm(x, gamma, beta, w, b))

    ref = reference(x, gamma, beta, w, b)
    assert out.shape == (B, S, D)
    assert jnp.allclose(out, ref, atol=1e-4, rtol=1e-4), "mismatch vs reference"

    print("KERNEL_OK")
</pallas_src>

<mosaic_0001>
module attributes {stable_mosaic.version = 11 : i64} {
  func.func @prenorm_single_tile_kernel(%arg0: i32, %arg1: memref<8x128xf32, #tpu.memory_space<vmem>>, %arg2: memref<1x128xf32, #tpu.memory_space<vmem>>, %arg3: memref<1x128xf32, #tpu.memory_space<vmem>>, %arg4: memref<128x128xf32, #tpu.memory_space<vmem>>, %arg5: memref<1x128xf32, #tpu.memory_space<vmem>>, %arg6: memref<8x128xf32, #tpu.memory_space<vmem>>) attributes {dimension_semantics = [#tpu.dimension_semantics<parallel>], iteration_bounds = array<i64: 2>, scalar_prefetch = 0 : i64, scratch_operands = 0 : i64, tpu.core_type = #tpu.core_type<tc>, window_params = [{transform_indices = @transform_0, window_bounds = array<i64: 8, 128>}, {pipeline_mode = #tpu.pipeline_mode<synchronous>, transform_indices = @transform_1, window_bounds = array<i64: 1, 128>}, {pipeline_mode = #tpu.pipeline_mode<synchronous>, transform_indices = @transform_2, window_bounds = array<i64: 1, 128>}, {pipeline_mode = #tpu.pipeline_mode<synchronous>, transform_indices = @transform_3, window_bounds = array<i64: 128, 128>}, {pipeline_mode = #tpu.pipeline_mode<synchronous>, transform_indices = @transform_4, window_bounds = array<i64: 1, 128>}, {transform_indices = @transform_5, window_bounds = array<i64: 8, 128>}]} {
    %c0 = arith.constant 0 : index
    %c0_0 = arith.constant 0 : index
    %0 = vector.load %arg1[%c0, %c0_0] : memref<8x128xf32, #tpu.memory_space<vmem>>, vector<8x128xf32>
    %1 = tpu.iota {dimensions = array<i32: 1>} : vector<8x128xi32>
    %c32_i32 = arith.constant 32 : i32
    %2 = vector.broadcast %c32_i32 : i32 to vector<8x128xi32>
    %3 = arith.cmpi slt, %1, %2 : vector<8x128xi32>
    %4 = arith.extui %3 : vector<8x128xi1> to vector<8x128xi32>
    %5 = arith.sitofp %4 : vector<8x128xi32> to vector<8x128xf32>
    %6 = arith.mulf %0, %5 : vector<8x128xf32>
    %cst = arith.constant dense<0.000000e+00> : vector<8xf32>
    %7 = vector.multi_reduction <add>, %6, %cst [1] : vector<8x128xf32> to vector<8xf32>
    %8 = vector.shape_cast %7 : vector<8xf32> to vector<8x1xf32>
    %cst_1 = arith.constant 3.125000e-02 : f32
    %9 = vector.broadcast %cst_1 : f32 to vector<8x1xf32>
    %10 = arith.mulf %8, %9 : vector<8x1xf32>
    %11 = vector.broadcast %10 : vector<8x1xf32> to vector<8x128xf32>
    %12 = arith.subf %6, %11 : vector<8x128xf32>
    %13 = arith.mulf %12, %5 : vector<8x128xf32>
    %14 = arith.mulf %13, %13 : vector<8x128xf32>
    %cst_2 = arith.constant dense<0.000000e+00> : vector<8xf32>
    %15 = vector.multi_reduction <add>, %14, %cst_2 [1] : vector<8x128xf32> to vector<8xf32>
    %16 = vector.shape_cast %15 : vector<8xf32> to vector<8x1xf32>
    %cst_3 = arith.constant 3.125000e-02 : f32
    %17 = vector.broadcast %cst_3 : f32 to vector<8x1xf32>
    %18 = arith.mulf %16, %17 : vector<8x1xf32>
    %cst_4 = arith.constant 9.99999974E-6 : f32
    %19 = vector.broadcast %cst_4 : f32 to vector<8x1xf32>
    %20 = arith.addf %18, %19 : vector<8x1xf32>
    %21 = math.rsqrt %20 : vector<8x1xf32>
    %22 = vector.broadcast %21 : vector<8x1xf32> to vector<8x128xf32>
    %23 = arith.mulf %13, %22 : vector<8x128xf32>
    %c0_5 = arith.constant 0 : index
    %c0_6 = arith.constant 0 : index
    %24 = vector.load %arg2[%c0_5, %c0_6] : memref<1x128xf32, #tpu.memory_space<vmem>>, vector<1x128xf32>
    %25 = vector.broadcast %24 : vector<1x128xf32> to vector<8x128xf32>
    %26 = arith.mulf %23, %25 : vector<8x128xf32>
    %c0_7 = arith.constant 0 : index
    %c0_8 = arith.constant 0 : index
    %27 = vector.load %arg3[%c0_7, %c0_8] : memref<1x128xf32, #tpu.memory_space<vmem>>, vector<1x128xf32>
    %28 = vector.broadcast %27 : vector<1x128xf32> to vector<8x128xf32>
    %29 = arith.addf %26, %28 : vector<8x128xf32>
    %c0_9 = arith.constant 0 : index
    %c0_10 = arith.constant 0 : index
    %30 = vector.load %arg4[%c0_9, %c0_10] : memref<128x128xf32, #tpu.memory_space<vmem>>, vector<128x128xf32>
    %cst_11 = arith.constant dense<0.000000e+00> : vector<8x128xf32>
    %31 = tpu.matmul %29, %30, %cst_11 {dimension_numbers = #tpu.dot_dimension_numbers<[1], [0], [0], [1], [0, 0, 1, 1], [], []>} : vector<8x128xf32>, vector<128x128xf32>, vector<8x128xf32> -> vector<8x128xf32>
    %c0_12 = arith.constant 0 : index
    %c0_13 = arith.constant 0 : index
    %32 = vector.load %arg5[%c0_12, %c0_13] : memref<1x128xf32, #tpu.memory_space<vmem>>, vector<1x128xf32>
    %33 = vector.broadcast %32 : vector<1x128xf32> to vector<8x128xf32>
    %34 = arith.addf %31, %33 : vector<8x128xf32>
    %c0_14 = arith.constant 0 : index
    %c0_15 = arith.constant 0 : index
    %35 = vector.load %arg6[%c0_14, %c0_15] : memref<8x128xf32, #tpu.memory_space<vmem>>, vector<8x128xf32>
    tpu.vector_store %arg6[%c0_14, %c0_15], %34 {strides = array<i32>} : memref<8x128xf32, #tpu.memory_space<vmem>>, vector<8x128xf32>,
    return
  }
  func.func @transform_0(%arg0: i32) -> (i32, i32) {
    %c0_i32 = arith.constant 0 : i32
    %c0_i32_0 = arith.constant 0 : i32
    return %arg0, %c0_i32 : i32, i32
  }
  func.func @transform_1(%arg0: i32) -> (i32, i32) {
    %c0_i32 = arith.constant 0 : i32
    %c0_i32_0 = arith.constant 0 : i32
    %c0_i32_1 = arith.constant 0 : i32
    return %c0_i32, %c0_i32_0 : i32, i32
  }
  func.func @transform_2(%arg0: i32) -> (i32, i32) {
    %c0_i32 = arith.constant 0 : i32
    %c0_i32_0 = arith.constant 0 : i32
    %c0_i32_1 = arith.constant 0 : i32
    return %c0_i32, %c0_i32_0 : i32, i32
  }
  func.func @transform_3(%arg0: i32) -> (i32, i32) {
    %c0_i32 = arith.constant 0 : i32
    %c0_i32_0 = arith.constant 0 : i32
    %c0_i32_1 = arith.constant 0 : i32
    return %c0_i32, %c0_i32_0 : i32, i32
  }
  func.func @transform_4(%arg0: i32) -> (i32, i32) {
    %c0_i32 = arith.constant 0 : i32
    %c0_i32_0 = arith.constant 0 : i32
    %c0_i32_1 = arith.constant 0 : i32
    return %c0_i32, %c0_i32_0 : i32, i32
  }
  func.func @transform_5(%arg0: i32) -> (i32, i32) {
    %c0_i32 = arith.constant 0 : i32
    %c0_i32_0 = arith.constant 0 : i32
    return %arg0, %c0_i32 : i32, i32
  }
}

</mosaic_0001>

<bundles_post_ra>
// kernel: prenorm.1
= control target key start
LH: loop header
LB: loop body
LE: loop exit
PB: predicated region body
PF: predicated region fallthrough
CT: control target
= control target key end

     0   :  { %s545_s18 = smov 0   ;;  %s626_s0 = inlined_call_operand.vmem [shape: f32[16,128], index: 0, kind: input, shape index: {}]   ;;  %s627_s1 = inlined_call_operand.vmem [shape: f32[1,128], index: 1, kind: input, shape index: {}]   ;;  %s628_s2 = inlined_call_operand.vmem [shape: f32[1,128], index: 2, kind: input, shape index: {}]   ;;  %s629_s3 = inlined_call_operand.vmem [shape: f32[128,128], index: 3, kind: input, shape index: {}]   ;;  %s630_s4 = inlined_call_operand.vmem [shape: f32[1,128], index: 4, kind: input, shape index: {}]   ;;  %s631_s5 = inlined_call_operand.vmem [shape: f32[16,128], index: 5, kind: output, shape index: {}]  }
   0x1 LB: > { %s402_s19 = sadd.s32 4294967295, %s510_s18   ;;  %p406_p0 = scmp.ge.s32.totalorder %s510_s18, 1  ;;  %s510_s18 = sphi %s545_s18, %s15_s18  }
   0x2   : > { %p186_p1 = scmp.lt.s32.totalorder %s510_s18, 3 }
   0x4   : > { %p187_p2 = pnand %p406_p0, %p186_p1 }
   0x5   : > { %p212_p3 = scmp.lt.s32.totalorder (!%p187_p2), %s402_s19, 1  ;;  %v221_v0 = vlaneseq (!%p187_p2)  ;;  %v512_v2 = vmov (!%p187_p2), 0.0   ;;  %v255_v6 = vld [vmem:[%s629_s3] sm:$0xff] (!%p187_p2)  ;;  %v256_v7 = vld [vmem:[%s629_s3 + $0x8] sm:$0xff] (!%p187_p2)  ;;  %v257_v8 = vld [vmem:[%s629_s3 + $0x10] sm:$0xff] (!%p187_p2)  ;;  %v513_v9 = vmov (!%p187_p2), 0.0|0.0  }
   0x6   : > { %190 = sbr.rel (%p187_p2) target bundleno = 547 (0x223), region = 40  ;;  %467 = vmatprep.subr.bf16.mxu0 (!%p187_p2), %v513_v9  ;;  %v468_v10 = vpack.c.bf16 (!%p187_p2), %v256_v7, %v255_v6  ;;  %v258_v11 = vld [vmem:[%s629_s3 + $0x18] sm:$0xff] (!%p187_p2)  ;;  %v259_v13 = vld [vmem:[%s629_s3 + $0x20] sm:$0xff] (!%p187_p2)  ;;  %v260_v14 = vld [vmem:[%s629_s3 + $0x28] sm:$0xff] (!%p187_p2)  ;;  %vm514_vm1 = vmmov (!%p187_p2), 0  }
   0x7   : > { %v222_v1 = vand.u32 (!%p187_p2), 127, %v221_v0  ;;  %v471_v12 = vpack.c.bf16 (!%p187_p2), %v258_v11, %v257_v8  ;;  %v474_v15 = vpack.c.bf16 (!%p187_p2), %v260_v14, %v259_v13  ;;  %v261_v21 = vld [vmem:[%s629_s3 + $0x30] sm:$0xff] (!%p187_p2)  ;;  %v262_v22 = vld [vmem:[%s629_s3 + $0x38] sm:$0xff] (!%p187_p2)  ;;  %v263_v24 = vld [vmem:[%s629_s3 + $0x40] sm:$0xff] (!%p187_p2)  ;;  %464 = vmatprep.mubr.msk.f32.mxu0 (!%p187_p2), %vm514_vm1, %v512_v2 }
   0x8   : > { %469 = vmatpush3.bf16.msra.mxu0 (!%p187_p2), %v468_v10  ;;  %v477_v23 = vpack.c.bf16 (!%p187_p2), %v262_v22, %v261_v21  ;;  %v264_v25 = vld [vmem:[%s629_s3 + $0x48] sm:$0xff] (!%p187_p2)  ;;  %v265_v27 = vld [vmem:[%s629_s3 + $0x50] sm:$0xff] (!%p187_p2)  ;;  %v266_v28 = vld [vmem:[%s629_s3 + $0x58] sm:$0xff] (!%p187_p2) }
   0x9   : > { %vm223_vm0 = vcmp.lt.s32.totalorder (!%p187_p2), %v222_v1, 32  ;;  %470 = vmatprep.subr.bf16.mxu0 (!%p187_p2), %v513_v9  ;;  %v480_v26 = vpack.c.bf16 (!%p187_p2), %v264_v25, %v263_v24  ;;  %v483_v29 = vpack.c.bf16 (!%p187_p2), %v266_v28, %v265_v27  ;;  %v267_v30 = vld [vmem:[%s629_s3 + $0x60] sm:$0xff] (!%p187_p2)  ;;  %v268_v31 = vld [vmem:[%s629_s3 + $0x68] sm:$0xff] (!%p187_p2)  ;;  %v269_v33 = vld [vmem:[%s629_s3 + $0x70] sm:$0xff] (!%p187_p2) }
   0xa   : > { %v409_v3 = vsel (!%p187_p2), %vm223_vm0, 1.0, %v512_v2  ;;  %v486_v32 = vpack.c.bf16 (!%p187_p2), %v268_v31, %v267_v30  ;;  %v270_v34 = vld [vmem:[%s629_s3 + $0x78] sm:$0xff] (!%p187_p2)  ;;  %v410_v40 = vld [vmem:[%s627_s1] ss:$0 sm:$0xff] (!%p187_p2) }
   0xb   : > { %v489_v35 = vpack.c.bf16 (!%p187_p2), %v270_v34, %v269_v33  ;;  %v411_v42 = vld [vmem:[%s628_s2] ss:$0 sm:$0xff] (!%p187_p2) }
   0xc   : > { %472 = vmatpush3.bf16.msra.mxu0 (!%p187_p2), %v471_v12  ;;  %v412_v45 = vld [vmem:[%s630_s4] ss:$0 sm:$0xff] (!%p187_p2) }
   0xd   : > { %s633_s19 = smov (!%p212_p3, %s402_s19), 1  ;;  %473 = vmatprep.subr.bf16.mxu0 %v513_v9 }
   0xe   : > { %s407_s20 = sshll.u32 %s633_s19, 3 }
   0xf   : > { %s215_s23 = scalar_lea.vmem %s626_s0, %s407_s20  ;;  %s219_s17 = scalar_lea.vmem %s631_s5, %s407_s20 }
  0x10   : > { %v220_v4 = vld [vmem:[%s215_s23] sm:$0xff]  ;;  %475 = vmatpush3.bf16.msra.mxu0 %v474_v15 }
  0x11   : > { %v226_v5 = vmul.f32 %v409_v3, %v220_v4  ;;  %476 = vmatprep.subr.bf16.mxu0 %v513_v9 }
  0x13   : > { %227 = vadd.xlane.f32.xlu0 %v226_v5 }
  0x14   : > { %478 = vmatpush3.bf16.msra.mxu0 %v477_v23 }
  0x15   : > { %479 = vmatprep.subr.bf16.mxu0 %v513_v9 }
  0x18   : > { %481 = vmatpush3.bf16.msra.mxu0 %v480_v26 }
  0x19   : > { %482 = vmatprep.subr.bf16.mxu0 %v513_v9 }
  0x1c   : > { %484 = vmatpush3.bf16.msra.mxu0 %v483_v29 }
  0x1d   : > { %485 = vmatprep.subr.bf16.mxu0 %v513_v9 }
  0x20   : > { %487 = vmatpush3.bf16.msra.mxu0 %v486_v32 }
  0x21   : > { %488 = vmatprep.subr.bf16.mxu0 %v513_v9 }
  0x24   : > { %490 = vmatpush3.bf16.msra.mxu0 %v489_v35 }
  0xa0   : > { %v228_v16 = vpop.xlane.xlu0 %227 }
  0xa1   : > { %v229_v17 = vmul.f32 0.03125, %v228_v16 }
  0xa3   : > { %v230_v18 = vsub.f32 %v226_v5, %v229_v17 }
  0xa5   : > { %v231_v19 = vmul.f32 %v409_v3, %v230_v18 }
  0xa7   : > { %v232_v20 = vmul.f32 %v231_v19, %v231_v19 }
  0xa9   : > { %233 = vadd.xlane.f32.xlu0 %v232_v20 }
 0x136   : > { %v234_v36 = vpop.xlane.xlu0 %233 }
 0x137   : > { %v235_v37 = vmul.f32 0.03125, %v234_v36 }
 0x139   : > { %v236_v38 = vadd.f32 1e-05, %v235_v37 }
 0x13b   : > { %502 = vrsqrt.f32 %v236_v38 }
 0x145   : > { %v503_v39 = vpop.eup %502 }
 0x146   : > { %v238_v41 = vmul.f32 %v503_v39, %v231_v19 }
 0x148   : > { %v246_v43 = vmul.f32 %v410_v40, %v238_v41 }
 0x14a   : > { %v254_v44 = vadd.f32 %v411_v42, %v246_v43 }
 0x14c   : > { %465 = vmatmul.mubr.f32.vlgmr.msra.gmra.mrb[0].mxu0 %v254_v44 }
 0x21f   : > { %v344_v46 = vpop.f32.mrb[0].mxu0 }
 0x220   : > { %v345_v47 = vadd.f32 %v412_v45, %v344_v46  ;;  %v466_v48 = vpop.f32.mrb[1].mxu0 }
 0x222   : > { %348 = vst [vmem:[%s219_s17] sm:$0xff] %v345_v47 }
 0x223 PF: > { %s15_s18 = sadd.s32 1, %s510_s18  }
 0x224   : > { %p12_p4 = scmp.ge.s32.totalorder %s15_s18, 4  }
 0x226   :  { %14 = sbr.rel (!%p12_p4) target bundleno = 1 (0x1), region = 70 }

</bundles_post_ra>
